<compile_context>
chip_gen: v7x
topology: tpu7x:2x2x1
jax: 0.10.0
libtpu: 0.0.40
codegen_flags: <defaults>
</compile_context>

<pallas_src>
import math
from functools import partial

import jax
import jax.numpy as jnp
from jax.experimental import pallas as pl
from jax.experimental.pallas import tpu as pltpu


_LN_EPS = 1e-6   # nn.LayerNorm(d_model, eps=1e-06)


# ----------------------------- hardware-aware sizing --------------------------------

def _vmem_capacity_bytes():
    try:
        return int(pltpu.get_tpu_info().vmem_capacity_bytes)
    except Exception:
        return 64 * 1024 * 1024        # conservative (v7x-sized) fallback


_VMEM_CAP = _vmem_capacity_bytes()
_VMEM_LIMIT = min(int(_VMEM_CAP * 3 // 4), 100 * 1024 * 1024)   # scoped-VMEM limit
_FFN_FUSE_BUDGET = int(_VMEM_CAP * 0.45)                        # ~58 MiB v5e/v6e, ~29 MiB v7x
# v7x (64 MiB VMEM) needs a smaller row tile when the full Dout axis stays resident.
_LN_ROW_CAP = 256 if _VMEM_CAP >= 96 * 1024 * 1024 else 128


def _round_up(x, m):
    return ((x + m - 1) // m) * m


def _row_tiling(M, cap=512):
    """(padded_M, tm).  Never lets tm fall to tiny 8-row tiles: small M becomes a single
    full tile; larger, awkward M is padded up to a multiple of a 128/256/512 tile."""
    if M <= cap:
        t = _round_up(M, 8)
        return t, t
    for t in (512, 256, 128):
        if t <= cap and M % t == 0:
            return M, t
    t = min(cap, 128)
    return _round_up(M, t), t


def _pick_lane_tile(dim):
    """K/N tile: prefer 512/256 (keeps the 256-wide MXU of v6e/v7x full); otherwise
    use the full dim rather than dropping to 128."""
    for c in (512, 256):
        if dim % c == 0:
            return c
    if dim <= 2048:
        return dim
    if dim % 128 == 0:
        return 128
    return dim


def _pick_tile(dim, candidates):
    for c in candidates:
        if c <= dim and dim % c == 0:
            return c
    return dim


# ------------------------------------ math helpers -----------------------------------

def _gelu(x):
    # tanh-approximate GELU; tanh goes to the EUP slot (co-issues with VALU/MXU).
    c = 0.7978845608028654  # sqrt(2/pi)
    return 0.5 * x * (1.0 + jnp.tanh(c * (x + 0.044715 * x * x * x)))


def _layernorm(x, gamma, beta, eps):
    mu = jnp.mean(x, axis=-1, keepdims=True)
    var = jnp.mean(jnp.square(x - mu), axis=-1, keepdims=True)
    return (x - mu) * jax.lax.rsqrt(var + eps) * gamma + beta


# --------------------------- tiled linear (M/N/K grid) -------------------------------

def _linear_kernel(x_ref, w_ref, b_ref, o_ref, acc_ref, *, activation):
    @pl.when(pl.program_id(2) == 0)
    def _():
        acc_ref[...] = jnp.zeros_like(acc_ref)

    acc_ref[...] += jnp.dot(x_ref[...].astype(jnp.bfloat16), w_ref[...],
                            preferred_element_type=jnp.float32)

    @pl.when(pl.program_id(2) == pl.num_programs(2) - 1)
    def _():
        y = acc_ref[...] + b_ref[...]
        if activation == "gelu":
            y = _gelu(y)
        o_ref[...] = y.astype(o_ref.dtype)


def linear(x2d, w, b, activation="none", out_dtype=jnp.float32):
    """y = act(x @ w + b).  x2d: (M, Din) f32/bf16, w: (Din, Dout) bf16, b: (1, Dout) f32."""
    M, Din = x2d.shape
    Dout = w.shape[1]
    Mp, tm = _row_tiling(M, cap=512)
    if Mp != M:
        x2d = jnp.pad(x2d, ((0, Mp - M), (0, 0)))
    tk = _pick_lane_tile(Din)
    tn = _pick_lane_tile(Dout)
    out_bytes = Mp * Dout * jnp.dtype(out_dtype).itemsize
    cost = pl.CostEstimate(
        flops=2 * Mp * Dout * Din,
        transcendentals=(Mp * Dout if activation == "gelu" else 0),
        bytes_accessed=int(x2d.size * x2d.dtype.itemsize + w.size * 2
                           + b.size * 4 + out_bytes))
    out = pl.pallas_call(
        partial(_linear_kernel, activation=activation),
        out_shape=jax.ShapeDtypeStruct((Mp, Dout), out_dtype),
        grid_spec=pltpu.PrefetchScalarGridSpec(
            num_scalar_prefetch=0,
            grid=(Mp // tm, Dout // tn, Din // tk),
            in_specs=[
                pl.BlockSpec((tm, tk), lambda i, j, k: (i, k)),
                pl.BlockSpec((tk, tn), lambda i, j, k: (k, j)),
                pl.BlockSpec((1, tn), lambda i, j, k: (0, j)),
            ],
            out_specs=pl.BlockSpec((tm, tn), lambda i, j, k: (i, j)),
            scratch_shapes=[pltpu.VMEM((tm, tn), jnp.float32)],
        ),
        compiler_params=pltpu.CompilerParams(
            dimension_semantics=("parallel", "parallel", "arbitrary"),
            vmem_limit_bytes=_VMEM_LIMIT),
        cost_estimate=cost,
    )(x2d, w, b)
    return out[:M] if Mp != M else out


# ---------------- linear with residual + LayerNorm fused in the epilogue -------------

def _linear_ln_kernel(x_ref, w_ref, b_ref, res_ref, g_ref, bt_ref, o_ref, acc_ref,
                      *, mode, activation, eps):
    @pl.when(pl.program_id(1) == 0)
    def _():
        acc_ref[...] = jnp.zeros_like(acc_ref)

    acc_ref[...] += jnp.dot(x_ref[...].astype(jnp.bfloat16), w_ref[...],
                            preferred_element_type=jnp.float32)

    @pl.when(pl.program_id(1) == pl.num_programs(1) - 1)
    def _():
        y = acc_ref[...] + b_ref[...]
        if activation == "gelu":
            y = _gelu(y)
        res = res_ref[...].astype(jnp.float32)
        if mode == "add_then_norm":       # MHA: LayerNorm(y + residual)
            y = _layernorm(y + res, g_ref[...], bt_ref[...], eps)
        else:                             # FFN: LayerNorm(y) + residual
            y = _layernorm(y, g_ref[...], bt_ref[...], eps) + res
        o_ref[...] = y.astype(o_ref.dtype)


def linear_ln(x2d, w, b, res2d, gamma, beta, mode, activation="none", eps=_LN_EPS):
    """Matmul + bias with residual-add + LayerNorm fused in the last-K epilogue.
    Keeps the full Dout axis resident, so the row tile is capped (128 on v7x)."""
    M, Din = x2d.shape
    Dout = w.shape[1]
    Mp, tm = _row_tiling(M, cap=_LN_ROW_CAP)
    if Mp != M:
        x2d = jnp.pad(x2d, ((0, Mp - M), (0, 0)))
        res2d = jnp.pad(res2d, ((0, Mp - M), (0, 0)))
    tk = _pick_lane_tile(Din)
    cost = pl.CostEstimate(
        flops=2 * Mp * Dout * Din,
        transcendentals=Mp,
        bytes_accessed=int(x2d.size * x2d.dtype.itemsize + w.size * 2
                           + res2d.size * 4 + 2 * Mp * Dout * 4))
    out = pl.pallas_call(
        partial(_linear_ln_kernel, mode=mode, activation=activation, eps=eps),
        out_shape=jax.ShapeDtypeStruct((Mp, Dout), jnp.float32),
        grid_spec=pltpu.PrefetchScalarGridSpec(
            num_scalar_prefetch=0,
            grid=(Mp // tm, Din // tk),
            in_specs=[
                pl.BlockSpec((tm, tk), lambda i, k: (i, k)),
                pl.BlockSpec((tk, Dout), lambda i, k: (k, 0)),
                pl.BlockSpec((1, Dout), lambda i, k: (0, 0)),
                pl.BlockSpec((tm, Dout), lambda i, k: (i, 0)),
                pl.BlockSpec((1, Dout), lambda i, k: (0, 0)),
                pl.BlockSpec((1, Dout), lambda i, k: (0, 0)),
            ],
            out_specs=pl.BlockSpec((tm, Dout), lambda i, k: (i, 0)),
            scratch_shapes=[pltpu.VMEM((tm, Dout), jnp.float32)],
        ),
        compiler_params=pltpu.CompilerParams(
            dimension_semantics=("parallel", "arbitrary"),
            vmem_limit_bytes=_VMEM_LIMIT),
        cost_estimate=cost,
    )(x2d, w, b, res2d, gamma, beta)
    return out[:M] if Mp != M else out


# ------------------------- fully fused FFN (weights in VMEM) -------------------------

def _ffn_fused_kernel(x_ref, w1_ref, b1_ref, w2_ref, b2_ref, w3_ref, b3_ref,
                      g_ref, bt_ref, o_ref, *, eps):
    x = x_ref[...].astype(jnp.float32)        # residual, stays in VMEM
    h = jnp.dot(x.astype(jnp.bfloat16), w1_ref[...], preferred_element_type=jnp.float32)
    h = _gelu(h + b1_ref[...])
    h = jnp.dot(h.astype(jnp.bfloat16), w2_ref[...], preferred_element_type=jnp.float32)
    h = _gelu(h + b2_ref[...])
    y = jnp.dot(h.astype(jnp.bfloat16), w3_ref[...], preferred_element_type=jnp.float32)
    y = y + b3_ref[...]
    y = _layernorm(y, g_ref[...], bt_ref[...], eps) + x   # residual AFTER the norm
    o_ref[...] = y.astype(o_ref.dtype)


def ffn_fused(x2d, w1, b1, w2, b2, w3, b3, gamma, beta, eps=_LN_EPS):
    M, D = x2d.shape
    Hd = w1.shape[1]
    Mp, tm = _row_tiling(M, cap=256)
    xp = jnp.pad(x2d, ((0, Mp - M), (0, 0))) if Mp != M else x2d
    cost = pl.CostEstimate(
        flops=2 * Mp * (D * Hd + Hd * Hd + Hd * D),
        transcendentals=2 * Mp * Hd + Mp,
        bytes_accessed=int(xp.size * xp.dtype.itemsize
                           + 2 * (w1.size + w2.size + w3.size) + Mp * D * 4))
    out = pl.pallas_call(
        partial(_ffn_fused_kernel, eps=eps),
        out_shape=jax.ShapeDtypeStruct((Mp, D), jnp.float32),
        grid_spec=pltpu.PrefetchScalarGridSpec(
            num_scalar_prefetch=0,
            grid=(Mp // tm,),
            in_specs=[
                pl.BlockSpec((tm, D), lambda i: (i, 0)),
                pl.BlockSpec((D, Hd), lambda i: (0, 0)),
                pl.BlockSpec((1, Hd), lambda i: (0, 0)),
                pl.BlockSpec((Hd, Hd), lambda i: (0, 0)),
                pl.BlockSpec((1, Hd), lambda i: (0, 0)),
                pl.BlockSpec((Hd, D), lambda i: (0, 0)),
                pl.BlockSpec((1, D), lambda i: (0, 0)),
                pl.BlockSpec((1, D), lambda i: (0, 0)),
                pl.BlockSpec((1, D), lambda i: (0, 0)),
            ],
            out_specs=pl.BlockSpec((tm, D), lambda i: (i, 0)),
        ),
        compiler_params=pltpu.CompilerParams(
            dimension_semantics=("parallel",),
            vmem_limit_bytes=_VMEM_LIMIT),
        cost_estimate=cost,
    )(xp, w1, b1, w2, b2, w3, b3, gamma, beta)
    return out[:M] if Mp != M else out


# ------------------------------------ plain LayerNorm --------------------------------

def _ln_kernel(x_ref, g_ref, b_ref, o_ref, *, eps):
    x = x_ref[...].astype(jnp.float32)
    o_ref[...] = _layernorm(x, g_ref[...], b_ref[...], eps).astype(o_ref.dtype)


def layernorm(x2d, gamma, beta, eps=_LN_EPS):
    M, D = x2d.shape
    Mp, tm = _row_tiling(M, cap=512)
    xp = jnp.pad(x2d, ((0, Mp - M), (0, 0))) if Mp != M else x2d
    out = pl.pallas_call(
        partial(_ln_kernel, eps=eps),
        out_shape=jax.ShapeDtypeStruct((Mp, D), jnp.float32),
        grid_spec=pltpu.PrefetchScalarGridSpec(
            num_scalar_prefetch=0,
            grid=(Mp // tm,),
            in_specs=[
                pl.BlockSpec((tm, D), lambda i: (i, 0)),
                pl.BlockSpec((1, D), lambda i: (0, 0)),
                pl.BlockSpec((1, D), lambda i: (0, 0)),
            ],
            out_specs=pl.BlockSpec((tm, D), lambda i: (i, 0)),
        ),
        compiler_params=pltpu.CompilerParams(
            dimension_semantics=("parallel",),
            vmem_limit_bytes=_VMEM_LIMIT),
    )(xp, gamma, beta)
    return out[:M] if Mp != M else out


# ------------------------------ attention (head-batched) -----------------------------

def _attention_kernel(q_ref, k_ref, v_ref, amq_ref, amk_ref, o_ref):
    q = q_ref[...]                               # (H, tq, dk) bf16 (1/sqrt(dk) folded in wq)
    k = k_ref[...]                               # (H, Sk, dk) bf16
    v = v_ref[...]                               # (H, Sk, dv) bf16
    tq, Sk = q.shape[1], k.shape[1]

    # All heads in one batched MXU pass (heads = batch dim of dot_general).
    s = jax.lax.dot_general(q, k, (((2,), (2,)), ((0,), (0,))),
                            preferred_element_type=jnp.float32)   # (H, tq, Sk)

    # pad mask (outer product of attention_mask) + causal tril, exactly as the reference
    # Decoder.forward builds `causal_mask` and hands it to the cross-attention.
    q_start = pl.program_id(1) * tq
    row = jax.lax.broadcasted_iota(jnp.int32, (1, tq, Sk), 1) + q_start
    col = jax.lax.broadcasted_iota(jnp.int32, (1, tq, Sk), 2)
    keep = (amq_ref[...] > 0.0) & (amk_ref[...] > 0.0) & (col <= row)
    s = jnp.where(keep, s, -1e9)                 # masked_fill(mask == 0, -1e9)

    s = s - jnp.max(s, axis=-1, keepdims=True)
    p = jnp.exp(s)
    p = p * pl.reciprocal(jnp.sum(p, axis=-1, keepdims=True), approx=True)
    ctx = jax.lax.dot_general(p.astype(v.dtype), v, (((2,), (1,)), ((0,), (0,))),
                              preferred_element_type=jnp.float32)  # (H, tq, dv)
    o_ref[...] = ctx.astype(o_ref.dtype)


def attention(q, k, v, am, n_head, d_k, d_v):
    """q: (B, Sq, H*dk) bf16, k: (B, Sk, H*dk) bf16, v: (B, Sk, H*dv) bf16, am: (B, S).
    Heads are moved to a batch dim (wrapper-side layout plumbing) so the kernel runs one
    batched dot_general per matmul instead of per-head 8-lane slices + concat."""
    B, Sq, _ = q.shape
    Sk = k.shape[1]
    H = n_head
    qh = q.reshape(B, Sq, H, d_k).transpose(0, 2, 1, 3).reshape(B * H, Sq, d_k)
    kh = k.reshape(B, Sk, H, d_k).transpose(0, 2, 1, 3).reshape(B * H, Sk, d_k)
    vh = v.reshape(B, Sk, H, d_v).transpose(0, 2, 1, 3).reshape(B * H, Sk, d_v)
    amq = am.reshape(B, Sq, 1).astype(jnp.float32)
    amk = am.reshape(B, 1, Sk).astype(jnp.float32)
    tq = _pick_tile(Sq, (512, 256, 128))
    cost = pl.CostEstimate(
        flops=2 * B * H * Sq * Sk * (d_k + d_v),
        transcendentals=B * H * Sq * Sk,
        bytes_accessed=int(2 * (qh.size + kh.size + vh.size + B * H * Sq * d_v)
                           + 4 * (amq.size + amk.size)))
    out = pl.pallas_call(
        _attention_kernel,
        out_shape=jax.ShapeDtypeStruct((B * H, Sq, d_v), jnp.bfloat16),
        grid_spec=pltpu.PrefetchScalarGridSpec(
            num_scalar_prefetch=0,
            grid=(B, Sq // tq),
            in_specs=[
                pl.BlockSpec((H, tq, d_k), lambda b, i: (b, i, 0)),
                pl.BlockSpec((H, Sk, d_k), lambda b, i: (b, 0, 0)),
                pl.BlockSpec((H, Sk, d_v), lambda b, i: (b, 0, 0)),
                pl.BlockSpec((1, tq, 1), lambda b, i: (b, i, 0)),
                pl.BlockSpec((1, 1, Sk), lambda b, i: (b, 0, 0)),
            ],
            out_specs=pl.BlockSpec((H, tq, d_v), lambda b, i: (b, i, 0)),
        ),
        compiler_params=pltpu.CompilerParams(
            dimension_semantics=("parallel", "parallel"),
            vmem_limit_bytes=_VMEM_LIMIT),
        cost_estimate=cost,
    )(qh, kh, vh, amq, amk)
    # back to (B*Sq, H*dv) (lane-dense layout for the output projection's matmul)
    return out.reshape(B, H, Sq, d_v).transpose(0, 2, 1, 3).reshape(B * Sq, H * d_v)


# ------------------------------ model (JAX glue) --------------------------------------

def mha_block(xq, xkv, am, p, n_head, d_k, d_v):
    B, Sq, D = xq.shape
    Sk = xkv.shape[1]
    xq2 = xq.reshape(B * Sq, D)
    xkv2 = xkv.reshape(B * Sk, D)
    # q/k/v projections emit bf16 (halves HBM traffic into the attention kernel).
    q = linear(xq2, p["wq"], p["bq"], out_dtype=jnp.bfloat16).reshape(B, Sq, n_head * d_k)
    k = linear(xkv2, p["wk"], p["bk"], out_dtype=jnp.bfloat16).reshape(B, Sk, n_head * d_k)
    v = linear(xkv2, p["wv"], p["bv"], out_dtype=jnp.bfloat16).reshape(B, Sk, n_head * d_v)
    o = attention(q, k, v, am, n_head, d_k, d_v)           # (B*Sq, H*dv) bf16
    # output projection -> dropout(identity) -> (+residual) -> LayerNorm, fused epilogue
    out = linear_ln(o, p["wo"], p["bo"], xq2, p["ln_g"], p["ln_b"], mode="add_then_norm")
    return out.reshape(B, Sq, D)


def ffn_block(x, p):
    B, S, D = x.shape
    M = B * S
    Hd = p["w1"].shape[1]
    x2 = x.reshape(M, D)
    _, tm = _row_tiling(M, cap=256)
    # VMEM estimate for the fully-fused path (bf16 weights x2 for double-buffering,
    # f32 x/out blocks x2, f32 (tm, d_hid) intermediates).
    est = (4 * (p["w1"].size + p["w2"].size + p["w3"].size)
           + 16 * tm * D + 8 * tm * Hd)
    if est <= _FFN_FUSE_BUDGET:
        out = ffn_fused(x2, p["w1"], p["b1"], p["w2"], p["b2"], p["w3"], p["b3"],
                        p["ln_g"], p["ln_b"])
    else:
        # K/N-tiled chain; fc1/fc2 hand off in bf16, fc3 fuses LayerNorm(+residual).
        h = linear(x2, p["w1"], p["b1"], activation="gelu", out_dtype=jnp.bfloat16)
        h = linear(h, p["w2"], p["b2"], activation="gelu", out_dtype=jnp.bfloat16)
        out = linear_ln(h, p["w3"], p["b3"], x2, p["ln_g"], p["ln_b"],
                        mode="norm_then_add")
    return out.reshape(B, S, D)


def decoder_forward(params, enc_out, input_ids, attention_mask, *, n_head, d_k, d_v):
    B, S = input_ids.shape
    D = params["word_emb"].shape[1]
    am = attention_mask.astype(jnp.float32)          # (B, S); pair + tril built in-kernel

    # word embedding (pad row zero) + sinusoidal positional embedding (JAX glue).
    x = params["word_emb"][input_ids] * math.sqrt(D) + params["pos_emb"][:S][None, :, :]
    x = layernorm(x.reshape(B * S, D), params["norm_g"], params["norm_b"]).reshape(B, S, D)
    # dropout -> identity (eval)

    for lp in params["layers"]:
        # DecoderLayer.forward: cross-attention (k = v = encoder output), then FFN.
        x = mha_block(x, enc_out, am, lp["cross_attn"], n_head, d_k, d_v)
        x = ffn_block(x, lp["ffn"])
    return {"last_hidden_state": x}


# ------------------------------ parameter init ----------------------------------------

def init_params(key, *, d_model, n_head, d_k, d_v, n_layers, vocab_size, pad_idx,
                max_seq_len):
    d_hid = d_model * 8
    keys = iter(jax.random.split(key, 2 + 16 * n_layers))

    def lin(din, dout):
        # weights stored in bf16 (MXU operand dtype), biases in f32.
        w = (jax.random.normal(next(keys), (din, dout), jnp.float32)
             / math.sqrt(din)).astype(jnp.bfloat16)
        b = (jax.random.normal(next(keys), (dout,), jnp.float32) * 0.01).reshape(1, dout)
        return w, b

    def ln_params():
        return (jnp.ones((1, d_model), jnp.float32),
                jnp.zeros((1, d_model), jnp.float32))

    word_emb = jax.random.normal(next(keys), (vocab_size, d_model), jnp.float32) * 0.02
    word_emb = word_emb.at[pad_idx].set(0.0)

    pos = jnp.arange(max_seq_len, dtype=jnp.float32)[:, None]
    even = jnp.arange(0, d_model, 2, dtype=jnp.float32)
    angle = pos / jnp.power(10000.0, even / d_model)
    pe = jnp.zeros((max_seq_len, d_model), jnp.float32)
    pe = pe.at[:, 0::2].set(jnp.sin(angle))
    pe = pe.at[:, 1::2].set(jnp.cos(angle))

    attn_scale = 1.0 / math.sqrt(d_k)
    layers = []
    for _ in range(n_layers):
        wq, bq = lin(d_model, n_head * d_k)
        # fold the 1/sqrt(d_k) attention scale into wq/bq (free; removes an in-kernel mul)
        wq = (wq.astype(jnp.float32) * attn_scale).astype(jnp.bfloat16)
        bq = bq * attn_scale
        wk, bk = lin(d_model, n_head * d_k)
        wv, bv = lin(d_model, n_head * d_v)
        wo, bo = lin(n_head * d_v, d_model)
        w1, b1 = lin(d_model, d_hid)
        w2, b2 = lin(d_hid, d_hid)
        w3, b3 = lin(d_hid, d_model)
        g1, be1 = ln_params()
        g2, be2 = ln_params()
        layers.append({
            "cross_attn": {"wq": wq, "bq": bq, "wk": wk, "bk": bk, "wv": wv, "bv": bv,
                           "wo": wo, "bo": bo, "ln_g": g1, "ln_b": be1},
            "ffn": {"w1": w1, "b1": b1, "w2": w2, "b2": b2, "w3": w3, "b3": b3,
                    "ln_g": g2, "ln_b": be2},
        })
    g0, be0 = ln_params()
    return {"word_emb": word_emb, "pos_emb": pe,
            "norm_g": g0, "norm_b": be0, "layers": layers}


# ----------------------------------- main ---------------------------------------------

if __name__ == "__main__":
    B, S = 2, 8
    d_model, n_head, d_k, d_v = 32, 4, 8, 8
    n_layers = 2
    vocab_size, pad_idx, max_seq_len = 50, 0, 16

    key = jax.random.PRNGKey(0)
    k_param, k_ids, k_enc = jax.random.split(key, 3)

    params = init_params(k_param, d_model=d_model, n_head=n_head, d_k=d_k, d_v=d_v,
                         n_layers=n_layers, vocab_size=vocab_size, pad_idx=pad_idx,
                         max_seq_len=max_seq_len)

    input_ids = jax.random.randint(k_ids, (B, S), 1, vocab_size, dtype=jnp.int32)
    attention_mask = jnp.array([[1, 1, 1, 1, 1, 1, 1, 1],
                                [1, 1, 1, 1, 1, 0, 0, 0]], dtype=jnp.float32)
    enc_out = jax.random.normal(k_enc, (B, S, d_model), jnp.float32)

    out = decoder_forward(params, enc_out, input_ids, attention_mask,
                          n_head=n_head, d_k=d_k, d_v=d_v)
    x = jax.block_until_ready(out["last_hidden_state"])
    assert x.shape == (B, S, d_model) and x.dtype == jnp.float32
    print("KERNEL_OK")
</pallas_src>

<mosaic_0001>
module attributes {stable_mosaic.version = 11 : i64} {
  func.func @_ln_kernel(%arg0: i32, %arg1: memref<16x32xf32, #tpu.memory_space<vmem>>, %arg2: memref<1x32xf32, #tpu.memory_space<vmem>>, %arg3: memref<1x32xf32, #tpu.memory_space<vmem>>, %arg4: memref<16x32xf32, #tpu.memory_space<vmem>>) attributes {dimension_semantics = [#tpu.dimension_semantics<parallel>], iteration_bounds = array<i64: 1>, scalar_prefetch = 0 : i64, scratch_operands = 0 : i64, tpu.core_type = #tpu.core_type<tc>, window_params = [{transform_indices = @transform_0, window_bounds = array<i64: 16, 32>}, {pipeline_mode = #tpu.pipeline_mode<synchronous>, transform_indices = @transform_1, window_bounds = array<i64: 1, 32>}, {pipeline_mode = #tpu.pipeline_mode<synchronous>, transform_indices = @transform_2, window_bounds = array<i64: 1, 32>}, {transform_indices = @transform_3, window_bounds = array<i64: 16, 32>}]} {
    %c0 = arith.constant 0 : index
    %c0_0 = arith.constant 0 : index
    %0 = vector.load %arg1[%c0, %c0_0] : memref<16x32xf32, #tpu.memory_space<vmem>>, vector<16x32xf32>
    %c0_1 = arith.constant 0 : index
    %c0_2 = arith.constant 0 : index
    %1 = vector.load %arg2[%c0_1, %c0_2] : memref<1x32xf32, #tpu.memory_space<vmem>>, vector<1x32xf32>
    %c0_3 = arith.constant 0 : index
    %c0_4 = arith.constant 0 : index
    %2 = vector.load %arg3[%c0_3, %c0_4] : memref<1x32xf32, #tpu.memory_space<vmem>>, vector<1x32xf32>
    %cst = arith.constant dense<0.000000e+00> : vector<16xf32>
    %3 = vector.multi_reduction <add>, %0, %cst [1] : vector<16x32xf32> to vector<16xf32>
    %4 = vector.shape_cast %3 : vector<16xf32> to vector<16x1xf32>
    %cst_5 = arith.constant 3.200000e+01 : f32
    %5 = vector.broadcast %cst_5 : f32 to vector<16x1xf32>
    %6 = arith.divf %4, %5 : vector<16x1xf32>
    %7 = vector.broadcast %6 : vector<16x1xf32> to vector<16x32xf32>
    %8 = arith.subf %0, %7 : vector<16x32xf32>
    %9 = arith.mulf %8, %8 : vector<16x32xf32>
    %cst_6 = arith.constant dense<0.000000e+00> : vector<16xf32>
    %10 = vector.multi_reduction <add>, %9, %cst_6 [1] : vector<16x32xf32> to vector<16xf32>
    %11 = vector.shape_cast %10 : vector<16xf32> to vector<16x1xf32>
    %cst_7 = arith.constant 3.200000e+01 : f32
    %12 = vector.broadcast %cst_7 : f32 to vector<16x1xf32>
    %13 = arith.divf %11, %12 : vector<16x1xf32>
    %14 = vector.broadcast %6 : vector<16x1xf32> to vector<16x32xf32>
    %15 = arith.subf %0, %14 : vector<16x32xf32>
    %cst_8 = arith.constant 9.99999997E-7 : f32
    %16 = vector.broadcast %cst_8 : f32 to vector<16x1xf32>
    %17 = arith.addf %13, %16 : vector<16x1xf32>
    %18 = math.rsqrt %17 : vector<16x1xf32>
    %19 = vector.broadcast %18 : vector<16x1xf32> to vector<16x32xf32>
    %20 = arith.mulf %15, %19 : vector<16x32xf32>
    %21 = vector.broadcast %1 : vector<1x32xf32> to vector<16x32xf32>
    %22 = arith.mulf %20, %21 : vector<16x32xf32>
    %23 = vector.broadcast %2 : vector<1x32xf32> to vector<16x32xf32>
    %24 = arith.addf %22, %23 : vector<16x32xf32>
    %c0_9 = arith.constant 0 : index
    %c0_10 = arith.constant 0 : index
    %25 = vector.load %arg4[%c0_9, %c0_10] : memref<16x32xf32, #tpu.memory_space<vmem>>, vector<16x32xf32>
    tpu.vector_store %arg4[%c0_9, %c0_10], %24 {strides = array<i32>} : memref<16x32xf32, #tpu.memory_space<vmem>>, vector<16x32xf32>,
    return
  }
  func.func @transform_0(%arg0: i32) -> (i32, i32) {
    %c0_i32 = arith.constant 0 : i32
    %c0_i32_0 = arith.constant 0 : i32
    return %arg0, %c0_i32 : i32, i32
  }
  func.func @transform_1(%arg0: i32) -> (i32, i32) {
    %c0_i32 = arith.constant 0 : i32
    %c0_i32_0 = arith.constant 0 : i32
    %c0_i32_1 = arith.constant 0 : i32
    return %c0_i32, %c0_i32_0 : i32, i32
  }
  func.func @transform_2(%arg0: i32) -> (i32, i32) {
    %c0_i32 = arith.constant 0 : i32
    %c0_i32_0 = arith.constant 0 : i32
    %c0_i32_1 = arith.constant 0 : i32
    return %c0_i32, %c0_i32_0 : i32, i32
  }
  func.func @transform_3(%arg0: i32) -> (i32, i32) {
    %c0_i32 = arith.constant 0 : i32
    %c0_i32_0 = arith.constant 0 : i32
    return %arg0, %c0_i32 : i32, i32
  }
}

</mosaic_0001>

<bundles_post_ra>
// kernel: tpu_custom_call.1
= control target key start
LH: loop header
LB: loop body
LE: loop exit
PB: predicated region body
PF: predicated region fallthrough
CT: control target
= control target key end

     0   :  { %8 = vsyncpa [#allocation3], 0  ;;  %s220_s0 = inlined_call_operand.hbm [shape: f32[16,32], index: 0, kind: input, shape index: {}]   ;;  %s221_s1 = inlined_call_operand.vmem [shape: f32[1,32], index: 1, kind: input, shape index: {}]   ;;  %s222_s2 = inlined_call_operand.vmem [shape: f32[1,32], index: 2, kind: input, shape index: {}]   ;;  %s223_s3 = inlined_call_operand.hbm [shape: f32[16,32], index: 3, kind: output, shape index: {}]  }
   0x1   :  { %9 = vsyncpa [#allocation4], 0  ;;  %s154_s12 = smov [#allocation2]   ;;  %s106_s16 = scalar_lea.hbm %s220_s0, 256 }
   0x2   :  { %s15_s13 = sshll.u32 %s154_s12, 4  ;;  %p107_p0 = scmp.ne.s32.totalorder %s220_s0, %s106_s16  ;;  %s16_s13 = int_to_ptr.vmem [resolvable:$true] %s15_s13 }
   0x3   :  { %p110_p1 = scmp.lt.u32.totalorder %s106_s16, %s220_s0 }
   0x5   :  { %p112_p2 = pnand %p110_p1, %p107_p0 }
   0x7   :  { %115 = shalt.err (!%p112_p2)
}
   0x8   :  { %s116_s21 = scalar_lea.vmem %s16_s13, 256  ;;  %p121_p4 = scmp.lt.s32.totalorder %s16_s13, %s16_s13 }
   0x9   :  { %p117_p3 = scmp.ne.s32.totalorder %s16_s13, %s116_s21  ;;  %p122_p5 = scmp.lt.s32.totalorder %s116_s21, %s116_s21 }
   0xb   :  { %p123_p6 = por %p122_p5, %p121_p4 }
   0xd   :  { %p124_p7 = pnand %p123_p6, %p117_p3 }
   0xf   :  { %127 = shalt.err (!%p124_p7)
}
  0x10   :  { %s155_s22 = smov 128   ;;  %s156_s23 = smov 8  }
  0x11   :  { %21 = dma.hbm_to_vmem [thread:$0]  %s220_s0, 256, %s16_s13, [#allocation3], %s155_s22, %s155_s22, %s156_s23  }
  0x12   :  { %150 = dma.done.wait [#allocation3], 256  }
  0x13   :  { %151 = vsyncadd [#allocation3], 4294967040  ;;  %vm33_vm0 = vcmask 261120   ;;  %v29_v0 = vld [vmem:[#allocation2] sm:$0xff]  ;;  %v30_v1 = vld [vmem:[#allocation2 + $0x8] sm:$0xff]  ;;  %s157_s29 = smov [#allocation5]  }
  0x14   :  { %v34_v2 = vsel %vm33_vm0, %v29_v0, 0.0  ;;  %v37_v3 = vsel %vm33_vm0, %v30_v1, 0.0  ;;  %v96_v21 = vld [vmem:[%s221_s1] ss:$0 sm:$0xff]  ;;  %s84_s30 = sshll.u32 %s157_s29, 4  ;;  %s85_s30 = int_to_ptr.vmem [resolvable:$true] %s84_s30 }
  0x15   :  { %35 = vadd.xlane.f32.xlu0 %v34_v2  ;;  %v97_v23 = vld [vmem:[%s222_s2] ss:$0 sm:$0xff]  ;;  %s128_s4 = scalar_lea.vmem %s85_s30, 256  ;;  %p133_p9 = scmp.lt.s32.totalorder %s85_s30, %s85_s30 }
  0x16   :  { %p129_p8 = scmp.ne.s32.totalorder %s85_s30, %s128_s4  ;;  %p134_p10 = scmp.lt.s32.totalorder %s128_s4, %s128_s4 }
  0x18   :  { %p135_p11 = por %p134_p10, %p133_p9 }
  0x19   :  { %38 = vadd.xlane.f32.xlu0 %v37_v3 }
  0x1a   :  { %p136_p12 = pnand %p135_p11, %p129_p8 }
  0xa2   :  { %v36_v4 = vpop.xlane.xlu0 %35 }
  0xa3   :  { %v41_v5 = vmul.f32 0.03125, %v36_v4 }
  0xa5   :  { %v43_v6 = vsub.f32 %v29_v0, %v41_v5 }
  0xa6   :  { %v39_v7 = vpop.xlane.xlu0 %38 }
  0xa7   :  { %v42_v8 = vmul.f32 0.03125, %v39_v7  ;;  %v45_v9 = vmul.f32 %v43_v6, %v43_v6 }
  0xa9   :  { %v44_v10 = vsub.f32 %v30_v1, %v42_v8  ;;  %v47_v11 = vsel %vm33_vm0, %v45_v9, 0.0 }
  0xaa   :  { %48 = vadd.xlane.f32.xlu1 %v47_v11 }
  0xab   :  { %v46_v12 = vmul.f32 %v44_v10, %v44_v10 }
  0xad   :  { %v50_v13 = vsel %vm33_vm0, %v46_v12, 0.0 }
  0xae   :  { %51 = vadd.xlane.f32.xlu1 %v50_v13 }
 0x137   :  { %v49_v14 = vpop.xlane.xlu1 %48 }
 0x138   :  { %v53_v15 = vmul.f32 0.03125, %v49_v14 }
 0x13a   :  { %v55_v16 = vadd.f32 1e-06, %v53_v15 }
 0x13b   :  { %v52_v17 = vpop.xlane.xlu1 %51 }
 0x13c   :  { %102 = vrsqrt.f32 %v55_v16  ;;  %v54_v18 = vmul.f32 0.03125, %v52_v17 }
 0x13e   :  { %v56_v19 = vadd.f32 1e-06, %v54_v18 }
 0x140   :  { %104 = vrsqrt.f32 %v56_v19 }
 0x146   :  { %v103_v20 = vpop.eup %102 }
 0x147   :  { %v59_v22 = vmul.f32 %v103_v20, %v43_v6 }
 0x149   :  { %v67_v24 = vmul.f32 %v96_v21, %v59_v22 }
 0x14a   :  { %v105_v25 = vpop.eup %104 }
 0x14b   :  { %v60_v26 = vmul.f32 %v105_v25, %v44_v10  ;;  %v75_v27 = vadd.f32 %v97_v23, %v67_v24 }
 0x14d   :  { %v68_v28 = vmul.f32 %v96_v21, %v60_v26  ;;  %77 = vst.msk [vmem:[#allocation5] sm:$0xff] %vm33_vm0, %v75_v27 }
 0x14f   :  { %v76_v29 = vadd.f32 %v97_v23, %v68_v28 }
 0x151   :  { %78 = vst.msk [vmem:[#allocation5 + $0x8] sm:$0xff] %vm33_vm0, %v76_v29 }
 0x152   :  { %139 = shalt.err (!%p136_p12)
}
 0x153   :  { %s140_s5 = scalar_lea.hbm %s223_s3, 256 }
 0x154   :  { %p141_p13 = scmp.ne.s32.totalorder %s223_s3, %s140_s5  ;;  %p144_p0 = scmp.lt.u32.totalorder %s140_s5, %s223_s3 }
 0x156   :  { %p146_p1 = pnand %p144_p0, %p141_p13 }
 0x158   :  { %149 = shalt.err (!%p146_p1)
}
 0x159   :  { %90 = dma.vmem_to_hbm [thread:$0]  %s85_s30, 256, %s223_s3, [#allocation4], %s155_s22, %s155_s22, %s156_s23  }
 0x15a   :  { %152 = dma.done.wait [#allocation4], 256  }
 0x15b   :  { %153 = vsyncadd [#allocation4], 4294967040 }
 0x15c   :  { %94 = vsyncpa [#allocation3], 1 }
 0x15d   :  { %95 = vsyncpa [#allocation4], 1 }

</bundles_post_ra>
